<compile_context>
chip_gen: v6e
topology: v6e:2x2x1
jax: 0.10.0
libtpu: 0.0.40
codegen_flags: <defaults>
</compile_context>

<pallas_src>
import math
import functools

import jax
import jax.numpy as jnp
from jax.experimental import pallas as pl
from jax.experimental.pallas import tpu as pltpu


L_MAX = 3                       # maximum harmonic order
NUM_ATOMS = (L_MAX + 1) ** 2    # 16 atoms, matches (L+1)**2 default of the module
LANES = 128                     # TPU lane width


def _norm(l, m):
    m = abs(m)
    k = math.sqrt(
        (2 * l + 1) / (4.0 * math.pi) * math.factorial(l - m) / math.factorial(l + m)
    )
    return k if m == 0 else math.sqrt(2.0) * k


def _assoc_legendre_all(ct, st, L):
    """P_l^m(cos theta) for 0 <= m <= l <= L (no Condon-Shortley). Reference only."""
    P = {(0, 0): jnp.ones_like(ct)}
    for m in range(1, L + 1):
        P[(m, m)] = (2.0 * m - 1.0) * st * P[(m - 1, m - 1)]
    for m in range(0, L):
        P[(m + 1, m)] = (2.0 * m + 1.0) * ct * P[(m, m)]
    for m in range(0, L + 1):
        for l in range(m + 2, L + 1):
            P[(l, m)] = (
                (2.0 * l - 1.0) * ct * P[(l - 1, m)] - (l + m - 1.0) * P[(l - 2, m)]
            ) / float(l - m)
    return P


def _solid_harmonics_kernel(c_ref, o_ref, *, L):
    # c_ref: (3, block_rows, 128) lane-dense (r, theta, phi) coordinate tile
    # o_ref: (A, block_rows, 128) — one dense slab per atom
    r = c_ref[0].astype(jnp.float32)
    theta = c_ref[1].astype(jnp.float32)
    phi = c_ref[2].astype(jnp.float32)

    # Only 4 transcendentals per point.
    ct = jnp.cos(theta)
    st = jnp.sin(theta)
    cp = jnp.cos(phi)
    sp = jnp.sin(phi)

    # Regular-solid-harmonic building blocks (r**l folded into the recurrence).
    rct = r * ct
    rst = r * st
    r2 = r * r

    def store(atom, val):
        if val.dtype != o_ref.dtype:
            val = val.astype(o_ref.dtype)
        o_ref[atom] = val

    # l = 0 atom is a constant.
    store(0, jnp.full(o_ref.shape[1:], _norm(0, 0), dtype=jnp.float32))

    # cos(m*phi)/sin(m*phi) via Chebyshev angle-addition (index 0 never needed).
    cos_m = [None, cp]
    sin_m = [None, sp]

    # Q_{l,m} = r^l * P_l^m(cos theta); keep only two previous degrees live.
    q_prev2 = None
    q_prev = [jnp.ones_like(r)]          # Q_{0,0} = 1

    for l in range(1, L + 1):
        if l == 2:
            cos_m.append(2.0 * cp * cp - 1.0)
            sin_m.append(2.0 * cp * sp)
        elif l >= 3:
            cos_m.append(2.0 * cp * cos_m[l - 1] - cos_m[l - 2])
            sin_m.append(2.0 * cp * sin_m[l - 1] - sin_m[l - 2])

        q_cur = []
        for m in range(0, l - 1):
            q_cur.append(
                ((2.0 * l - 1.0) * rct * q_prev[m]
                 - float(l + m - 1) * r2 * q_prev2[m]) / float(l - m)
            )
        # m = l-1 and m = l seeds of the recurrence
        q_cur.append((2.0 * l - 1.0) * rct * q_prev[l - 1])
        q_cur.append((2.0 * l - 1.0) * rst * q_prev[l - 1])

        base_idx = l * l + l            # channel index of (l, m=0)
        for am in range(0, l + 1):
            base = _norm(l, am) * q_cur[am]   # shared between +m / -m atoms
            if am == 0:
                store(base_idx, base)
            else:
                store(base_idx + am, base * cos_m[am])   # m = +am  -> cos
                store(base_idx - am, base * sin_m[am])   # m = -am  -> sin

        q_prev2, q_prev = q_prev, q_cur


def regular_solid_harmonics_pe(x, L=L_MAX, block_rows=256, out_dtype=None):
    """x: (..., 3) (r, theta, phi) -> (..., (L+1)^2)."""
    batch_shape = x.shape[:-1]
    A = (L + 1) ** 2
    out_dtype = x.dtype if out_dtype is None else jnp.dtype(out_dtype)

    xf = x.reshape(-1, 3)
    N = xf.shape[0]

    # Clamp the tile so there are at least 2 grid steps when the data allows it
    # (v7x: 2 TensorCores share the "parallel" axis) and tiny inputs are not
    # padded to a huge tile.
    rows_needed = pl.cdiv(N, LANES)
    half_rows = ((pl.cdiv(rows_needed, 2) + 7) // 8) * 8
    block_rows = max(8, min(block_rows, half_rows))

    pts_per_step = block_rows * LANES
    n_steps = pl.cdiv(N, pts_per_step)
    Npad = n_steps * pts_per_step

    # Single fused input layout op: pad + (N,3) -> (3, R, 128) lane-dense slab.
    if Npad != N:
        xf = jnp.pad(xf, ((0, Npad - N), (0, 0)))
    R = Npad // LANES
    coords = xf.T.reshape(3, R, LANES)

    kernel = functools.partial(_solid_harmonics_kernel, L=L)

    # VMEM budget: double-buffered input + output blocks plus live-intermediate
    # scratch, with headroom; v5e's scoped default is only 16 MiB.
    tile_f32 = block_rows * LANES * 4
    need = (2 * 3 * tile_f32                                   # input blocks
            + 2 * A * block_rows * LANES * out_dtype.itemsize  # output blocks
            + 24 * tile_f32)                                   # intermediates/spill
    vmem_limit = min(int(1.5 * need) + (2 << 20), 64 << 20)

    out = pl.pallas_call(
        kernel,
        out_shape=jax.ShapeDtypeStruct((A, R, LANES), out_dtype),
        grid_spec=pltpu.PrefetchScalarGridSpec(
            num_scalar_prefetch=0,
            grid=(n_steps,),
            in_specs=[pl.BlockSpec((3, block_rows, LANES), lambda i: (0, i, 0))],
            out_specs=pl.BlockSpec((A, block_rows, LANES), lambda i: (0, i, 0)),
        ),
        compiler_params=pltpu.CompilerParams(
            dimension_semantics=("parallel",),
            vmem_limit_bytes=vmem_limit,
        ),
    )(coords)

    # TODO(synk): downstream consumers should take the (A, N) channel-major
    # kernel output directly (fold this transpose into their first matmul);
    # materializing (N, A) here costs one extra HBM round-trip of the output.
    out = out.transpose(1, 2, 0).reshape(Npad, A)
    if Npad != N:
        out = out[:N]
    return out.reshape(*batch_shape, A)


def _reference(x, L=L_MAX):
    """Pure-JAX reference with the module's direct formula (independent trig)."""
    r = x[..., 0:1]
    theta = x[..., 1:2]
    phi = x[..., 2:3]
    ct, st = jnp.cos(theta), jnp.sin(theta)
    P = _assoc_legendre_all(ct, st, L)
    cols = []
    for l in range(L + 1):
        for m in range(-l, l + 1):
            n = _norm(l, m)
            if m > 0:
                trig = jnp.cos(m * phi)
            elif m < 0:
                trig = jnp.sin(-m * phi)
            else:
                trig = jnp.ones_like(phi)
            cols.append(n * P[(l, abs(m))] * trig * (r ** l))
    return jnp.concatenate(cols, axis=-1)


def _make_input(key, batch):
    k_r, k_t, k_p = jax.random.split(key, 3)
    r = jax.random.uniform(k_r, batch + (1,), jnp.float32, 0.5, 1.5)
    theta = jax.random.uniform(k_t, batch + (1,), jnp.float32, 0.0, math.pi)
    phi = jax.random.uniform(k_p, batch + (1,), jnp.float32, 0.0, 2.0 * math.pi)
    return jnp.concatenate([r, theta, phi], axis=-1)   # (..., 3) = (r, theta, phi)


if __name__ == "__main__":
    key = jax.random.PRNGKey(0)
    k1, k2 = jax.random.split(key)

    # Main test: 2*4*256 = 2048 points -> 2 grid steps, no padding.
    batch = (2, 4, 256)
    x = _make_input(k1, batch)
    out = jax.block_until_ready(regular_solid_harmonics_pe(x))
    ref = _reference(x)
    assert out.shape == batch + (NUM_ATOMS,)
    assert jnp.allclose(out, ref, atol=1e-4, rtol=1e-4)

    # Ragged test: 3*5*7 = 105 points exercises the zero-padding path.
    batch2 = (3, 5, 7)
    x2 = _make_input(k2, batch2)
    out2 = jax.block_until_ready(regular_solid_harmonics_pe(x2))
    ref2 = _reference(x2)
    assert out2.shape == batch2 + (NUM_ATOMS,)
    assert jnp.allclose(out2, ref2, atol=1e-4, rtol=1e-4)

    print("KERNEL_OK")
</pallas_src>

<mosaic_0001>
module attributes {stable_mosaic.version = 11 : i64} {
  func.func @_solid_harmonics_kernel(%arg0: i32, %arg1: memref<3x8x128xf32, #tpu.memory_space<vmem>>, %arg2: memref<16x8x128xf32, #tpu.memory_space<vmem>>) attributes {dimension_semantics = [#tpu.dimension_semantics<parallel>], iteration_bounds = array<i64: 2>, scalar_prefetch = 0 : i64, scratch_operands = 0 : i64, tpu.core_type = #tpu.core_type<tc>, window_params = [{transform_indices = @transform_0, window_bounds = array<i64: 3, 8, 128>}, {transform_indices = @transform_1, window_bounds = array<i64: 16, 8, 128>}]} {
    %c0 = arith.constant 0 : index
    %c0_0 = arith.constant 0 : index
    %c0_1 = arith.constant 0 : index
    %0 = vector.load %arg1[%c0, %c0_0, %c0_1] : memref<3x8x128xf32, #tpu.memory_space<vmem>>, vector<1x8x128xf32>
    %1 = vector.shape_cast %0 : vector<1x8x128xf32> to vector<8x128xf32>
    %c1 = arith.constant 1 : index
    %c0_2 = arith.constant 0 : index
    %c0_3 = arith.constant 0 : index
    %2 = vector.load %arg1[%c1, %c0_2, %c0_3] : memref<3x8x128xf32, #tpu.memory_space<vmem>>, vector<1x8x128xf32>
    %3 = vector.shape_cast %2 : vector<1x8x128xf32> to vector<8x128xf32>
    %c2 = arith.constant 2 : index
    %c0_4 = arith.constant 0 : index
    %c0_5 = arith.constant 0 : index
    %4 = vector.load %arg1[%c2, %c0_4, %c0_5] : memref<3x8x128xf32, #tpu.memory_space<vmem>>, vector<1x8x128xf32>
    %5 = vector.shape_cast %4 : vector<1x8x128xf32> to vector<8x128xf32>
    %6 = math.cos %3 : vector<8x128xf32>
    %7 = math.sin %3 : vector<8x128xf32>
    %8 = math.cos %5 : vector<8x128xf32>
    %9 = math.sin %5 : vector<8x128xf32>
    %10 = arith.mulf %1, %6 : vector<8x128xf32>
    %11 = arith.mulf %1, %7 : vector<8x128xf32>
    %12 = arith.mulf %1, %1 : vector<8x128xf32>
    %cst = arith.constant 0.282094806 : f32
    %13 = vector.broadcast %cst : f32 to vector<8x128xf32>
    %c0_6 = arith.constant 0 : index
    %c0_7 = arith.constant 0 : index
    %c0_8 = arith.constant 0 : index
    %14 = vector.load %arg2[%c0_6, %c0_7, %c0_8] : memref<16x8x128xf32, #tpu.memory_space<vmem>>, vector<1x8x128xf32>
    %15 = vector.shape_cast %14 : vector<1x8x128xf32> to vector<8x128xf32>
    %16 = vector.shape_cast %13 : vector<8x128xf32> to vector<1x8x128xf32>
    tpu.vector_store %arg2[%c0_6, %c0_7, %c0_8], %16 {strides = array<i32>} : memref<16x8x128xf32, #tpu.memory_space<vmem>>, vector<1x8x128xf32>,
    %cst_9 = arith.constant 1.000000e+00 : f32
    %17 = vector.broadcast %cst_9 : f32 to vector<8x128xf32>
    %cst_10 = arith.constant 1.000000e+00 : f32
    %18 = vector.broadcast %cst_10 : f32 to vector<8x128xf32>
    %19 = arith.mulf %18, %10 : vector<8x128xf32>
    %20 = arith.mulf %19, %17 : vector<8x128xf32>
    %cst_11 = arith.constant 1.000000e+00 : f32
    %21 = vector.broadcast %cst_11 : f32 to vector<8x128xf32>
    %22 = arith.mulf %21, %11 : vector<8x128xf32>
    %23 = arith.mulf %22, %17 : vector<8x128xf32>
    %cst_12 = arith.constant 0.488602519 : f32
    %24 = vector.broadcast %cst_12 : f32 to vector<8x128xf32>
    %25 = arith.mulf %24, %20 : vector<8x128xf32>
    %c2_13 = arith.constant 2 : index
    %c0_14 = arith.constant 0 : index
    %c0_15 = arith.constant 0 : index
    %26 = vector.load %arg2[%c2_13, %c0_14, %c0_15] : memref<16x8x128xf32, #tpu.memory_space<vmem>>, vector<1x8x128xf32>
    %27 = vector.shape_cast %26 : vector<1x8x128xf32> to vector<8x128xf32>
    %28 = vector.shape_cast %25 : vector<8x128xf32> to vector<1x8x128xf32>
    tpu.vector_store %arg2[%c2_13, %c0_14, %c0_15], %28 {strides = array<i32>} : memref<16x8x128xf32, #tpu.memory_space<vmem>>, vector<1x8x128xf32>,
    %cst_16 = arith.constant 0.488602519 : f32
    %29 = vector.broadcast %cst_16 : f32 to vector<8x128xf32>
    %30 = arith.mulf %29, %23 : vector<8x128xf32>
    %31 = arith.mulf %30, %8 : vector<8x128xf32>
    %c3 = arith.constant 3 : index
    %c0_17 = arith.constant 0 : index
    %c0_18 = arith.constant 0 : index
    %32 = vector.load %arg2[%c3, %c0_17, %c0_18] : memref<16x8x128xf32, #tpu.memory_space<vmem>>, vector<1x8x128xf32>
    %33 = vector.shape_cast %32 : vector<1x8x128xf32> to vector<8x128xf32>
    %34 = vector.shape_cast %31 : vector<8x128xf32> to vector<1x8x128xf32>
    tpu.vector_store %arg2[%c3, %c0_17, %c0_18], %34 {strides = array<i32>} : memref<16x8x128xf32, #tpu.memory_space<vmem>>, vector<1x8x128xf32>,
    %35 = arith.mulf %30, %9 : vector<8x128xf32>
    %c1_19 = arith.constant 1 : index
    %c0_20 = arith.constant 0 : index
    %c0_21 = arith.constant 0 : index
    %36 = vector.load %arg2[%c1_19, %c0_20, %c0_21] : memref<16x8x128xf32, #tpu.memory_space<vmem>>, vector<1x8x128xf32>
    %37 = vector.shape_cast %36 : vector<1x8x128xf32> to vector<8x128xf32>
    %38 = vector.shape_cast %35 : vector<8x128xf32> to vector<1x8x128xf32>
    tpu.vector_store %arg2[%c1_19, %c0_20, %c0_21], %38 {strides = array<i32>} : memref<16x8x128xf32, #tpu.memory_space<vmem>>, vector<1x8x128xf32>,
    %cst_22 = arith.constant 2.000000e+00 : f32
    %39 = vector.broadcast %cst_22 : f32 to vector<8x128xf32>
    %40 = arith.mulf %39, %8 : vector<8x128xf32>
    %41 = arith.mulf %40, %8 : vector<8x128xf32>
    %cst_23 = arith.constant 1.000000e+00 : f32
    %42 = vector.broadcast %cst_23 : f32 to vector<8x128xf32>
    %43 = arith.subf %41, %42 : vector<8x128xf32>
    %cst_24 = arith.constant 2.000000e+00 : f32
    %44 = vector.broadcast %cst_24 : f32 to vector<8x128xf32>
    %45 = arith.mulf %44, %8 : vector<8x128xf32>
    %46 = arith.mulf %45, %9 : vector<8x128xf32>
    %cst_25 = arith.constant 3.000000e+00 : f32
    %47 = vector.broadcast %cst_25 : f32 to vector<8x128xf32>
    %48 = arith.mulf %47, %10 : vector<8x128xf32>
    %49 = arith.mulf %48, %20 : vector<8x128xf32>
    %cst_26 = arith.constant 1.000000e+00 : f32
    %50 = vector.broadcast %cst_26 : f32 to vector<8x128xf32>
    %51 = arith.mulf %50, %12 : vector<8x128xf32>
    %52 = arith.mulf %51, %17 : vector<8x128xf32>
    %53 = arith.subf %49, %52 : vector<8x128xf32>
    %cst_27 = arith.constant 2.000000e+00 : f32
    %54 = vector.broadcast %cst_27 : f32 to vector<8x128xf32>
    %55 = arith.divf %53, %54 : vector<8x128xf32>
    %cst_28 = arith.constant 3.000000e+00 : f32
    %56 = vector.broadcast %cst_28 : f32 to vector<8x128xf32>
    %57 = arith.mulf %56, %10 : vector<8x128xf32>
    %58 = arith.mulf %57, %23 : vector<8x128xf32>
    %cst_29 = arith.constant 3.000000e+00 : f32
    %59 = vector.broadcast %cst_29 : f32 to vector<8x128xf32>
    %60 = arith.mulf %59, %11 : vector<8x128xf32>
    %61 = arith.mulf %60, %23 : vector<8x128xf32>
    %cst_30 = arith.constant 0.63078314 : f32
    %62 = vector.broadcast %cst_30 : f32 to vector<8x128xf32>
    %63 = arith.mulf %62, %55 : vector<8x128xf32>
    %c6 = arith.constant 6 : index
    %c0_31 = arith.constant 0 : index
    %c0_32 = arith.constant 0 : index
    %64 = vector.load %arg2[%c6, %c0_31, %c0_32] : memref<16x8x128xf32, #tpu.memory_space<vmem>>, vector<1x8x128xf32>
    %65 = vector.shape_cast %64 : vector<1x8x128xf32> to vector<8x128xf32>
    %66 = vector.shape_cast %63 : vector<8x128xf32> to vector<1x8x128xf32>
    tpu.vector_store %arg2[%c6, %c0_31, %c0_32], %66 {strides = array<i32>} : memref<16x8x128xf32, #tpu.memory_space<vmem>>, vector<1x8x128xf32>,
    %cst_33 = arith.constant 0.3641828 : f32
    %67 = vector.broadcast %cst_33 : f32 to vector<8x128xf32>
    %68 = arith.mulf %67, %58 : vector<8x128xf32>
    %69 = arith.mulf %68, %8 : vector<8x128xf32>
    %c7 = arith.constant 7 : index
    %c0_34 = arith.constant 0 : index
    %c0_35 = arith.constant 0 : index
    %70 = vector.load %arg2[%c7, %c0_34, %c0_35] : memref<16x8x128xf32, #tpu.memory_space<vmem>>, vector<1x8x128xf32>
    %71 = vector.shape_cast %70 : vector<1x8x128xf32> to vector<8x128xf32>
    %72 = vector.shape_cast %69 : vector<8x128xf32> to vector<1x8x128xf32>
    tpu.vector_store %arg2[%c7, %c0_34, %c0_35], %72 {strides = array<i32>} : memref<16x8x128xf32, #tpu.memory_space<vmem>>, vector<1x8x128xf32>,
    %73 = arith.mulf %68, %9 : vector<8x128xf32>
    %c5 = arith.constant 5 : index
    %c0_36 = arith.constant 0 : index
    %c0_37 = arith.constant 0 : index
    %74 = vector.load %arg2[%c5, %c0_36, %c0_37] : memref<16x8x128xf32, #tpu.memory_space<vmem>>, vector<1x8x128xf32>
    %75 = vector.shape_cast %74 : vector<1x8x128xf32> to vector<8x128xf32>
    %76 = vector.shape_cast %73 : vector<8x128xf32> to vector<1x8x128xf32>
    tpu.vector_store %arg2[%c5, %c0_36, %c0_37], %76 {strides = array<i32>} : memref<16x8x128xf32, #tpu.memory_space<vmem>>, vector<1x8x128xf32>,
    %cst_38 = arith.constant 0.1820914 : f32
    %77 = vector.broadcast %cst_38 : f32 to vector<8x128xf32>
    %78 = arith.mulf %77, %61 : vector<8x128xf32>
    %79 = arith.mulf %78, %43 : vector<8x128xf32>
    %c8 = arith.constant 8 : index
    %c0_39 = arith.constant 0 : index
    %c0_40 = arith.constant 0 : index
    %80 = vector.load %arg2[%c8, %c0_39, %c0_40] : memref<16x8x128xf32, #tpu.memory_space<vmem>>, vector<1x8x128xf32>
    %81 = vector.shape_cast %80 : vector<1x8x128xf32> to vector<8x128xf32>
    %82 = vector.shape_cast %79 : vector<8x128xf32> to vector<1x8x128xf32>
    tpu.vector_store %arg2[%c8, %c0_39, %c0_40], %82 {strides = array<i32>} : memref<16x8x128xf32, #tpu.memory_space<vmem>>, vector<1x8x128xf32>,
    %83 = arith.mulf %78, %46 : vector<8x128xf32>
    %c4 = arith.constant 4 : index
    %c0_41 = arith.constant 0 : index
    %c0_42 = arith.constant 0 : index
    %84 = vector.load %arg2[%c4, %c0_41, %c0_42] : memref<16x8x128xf32, #tpu.memory_space<vmem>>, vector<1x8x128xf32>
    %85 = vector.shape_cast %84 : vector<1x8x128xf32> to vector<8x128xf32>
    %86 = vector.shape_cast %83 : vector<8x128xf32> to vector<1x8x128xf32>
    tpu.vector_store %arg2[%c4, %c0_41, %c0_42], %86 {strides = array<i32>} : memref<16x8x128xf32, #tpu.memory_space<vmem>>, vector<1x8x128xf32>,
    %cst_43 = arith.constant 2.000000e+00 : f32
    %87 = vector.broadcast %cst_43 : f32 to vector<8x128xf32>
    %88 = arith.mulf %87, %8 : vector<8x128xf32>
    %89 = arith.mulf %88, %43 : vector<8x128xf32>
    %90 = arith.subf %89, %8 : vector<8x128xf32>
    %cst_44 = arith.constant 2.000000e+00 : f32
    %91 = vector.broadcast %cst_44 : f32 to vector<8x128xf32>
    %92 = arith.mulf %91, %8 : vector<8x128xf32>
    %93 = arith.mulf %92, %46 : vector<8x128xf32>
    %94 = arith.subf %93, %9 : vector<8x128xf32>
    %cst_45 = arith.constant 5.000000e+00 : f32
    %95 = vector.broadcast %cst_45 : f32 to vector<8x128xf32>
    %96 = arith.mulf %95, %10 : vector<8x128xf32>
    %97 = arith.mulf %96, %55 : vector<8x128xf32>
    %cst_46 = arith.constant 2.000000e+00 : f32
    %98 = vector.broadcast %cst_46 : f32 to vector<8x128xf32>
    %99 = arith.mulf %98, %12 : vector<8x128xf32>
    %100 = arith.mulf %99, %20 : vector<8x128xf32>
    %101 = arith.subf %97, %100 : vector<8x128xf32>
    %cst_47 = arith.constant 3.000000e+00 : f32
    %102 = vector.broadcast %cst_47 : f32 to vector<8x128xf32>
    %103 = arith.divf %101, %102 : vector<8x128xf32>
    %cst_48 = arith.constant 5.000000e+00 : f32
    %104 = vector.broadcast %cst_48 : f32 to vector<8x128xf32>
    %105 = arith.mulf %104, %10 : vector<8x128xf32>
    %106 = arith.mulf %105, %58 : vector<8x128xf32>
    %cst_49 = arith.constant 3.000000e+00 : f32
    %107 = vector.broadcast %cst_49 : f32 to vector<8x128xf32>
    %108 = arith.mulf %107, %12 : vector<8x128xf32>
    %109 = arith.mulf %108, %23 : vector<8x128xf32>
    %110 = arith.subf %106, %109 : vector<8x128xf32>
    %cst_50 = arith.constant 2.000000e+00 : f32
    %111 = vector.broadcast %cst_50 : f32 to vector<8x128xf32>
    %112 = arith.divf %110, %111 : vector<8x128xf32>
    %cst_51 = arith.constant 5.000000e+00 : f32
    %113 = vector.broadcast %cst_51 : f32 to vector<8x128xf32>
    %114 = arith.mulf %113, %10 : vector<8x128xf32>
    %115 = arith.mulf %114, %61 : vector<8x128xf32>
    %cst_52 = arith.constant 5.000000e+00 : f32
    %116 = vector.broadcast %cst_52 : f32 to vector<8x128xf32>
    %117 = arith.mulf %116, %11 : vector<8x128xf32>
    %118 = arith.mulf %117, %61 : vector<8x128xf32>
    %cst_53 = arith.constant 0.746352672 : f32
    %119 = vector.broadcast %cst_53 : f32 to vector<8x128xf32>
    %120 = arith.mulf %119, %103 : vector<8x128xf32>
    %c12 = arith.constant 12 : index
    %c0_54 = arith.constant 0 : index
    %c0_55 = arith.constant 0 : index
    %121 = vector.load %arg2[%c12, %c0_54, %c0_55] : memref<16x8x128xf32, #tpu.memory_space<vmem>>, vector<1x8x128xf32>
    %122 = vector.shape_cast %121 : vector<1x8x128xf32> to vector<8x128xf32>
    %123 = vector.shape_cast %120 : vector<8x128xf32> to vector<1x8x128xf32>
    tpu.vector_store %arg2[%c12, %c0_54, %c0_55], %123 {strides = array<i32>} : memref<16x8x128xf32, #tpu.memory_space<vmem>>, vector<1x8x128xf32>,
    %cst_56 = arith.constant 0.304697186 : f32
    %124 = vector.broadcast %cst_56 : f32 to vector<8x128xf32>
    %125 = arith.mulf %124, %112 : vector<8x128xf32>
    %126 = arith.mulf %125, %8 : vector<8x128xf32>
    %c13 = arith.constant 13 : index
    %c0_57 = arith.constant 0 : index
    %c0_58 = arith.constant 0 : index
    %127 = vector.load %arg2[%c13, %c0_57, %c0_58] : memref<16x8x128xf32, #tpu.memory_space<vmem>>, vector<1x8x128xf32>
    %128 = vector.shape_cast %127 : vector<1x8x128xf32> to vector<8x128xf32>
    %129 = vector.shape_cast %126 : vector<8x128xf32> to vector<1x8x128xf32>
    tpu.vector_store %arg2[%c13, %c0_57, %c0_58], %129 {strides = array<i32>} : memref<16x8x128xf32, #tpu.memory_space<vmem>>, vector<1x8x128xf32>,
    %130 = arith.mulf %125, %9 : vector<8x128xf32>
    %c11 = arith.constant 11 : index
    %c0_59 = arith.constant 0 : index
    %c0_60 = arith.constant 0 : index
    %131 = vector.load %arg2[%c11, %c0_59, %c0_60] : memref<16x8x128xf32, #tpu.memory_space<vmem>>, vector<1x8x128xf32>
    %132 = vector.shape_cast %131 : vector<1x8x128xf32> to vector<8x128xf32>
    %133 = vector.shape_cast %130 : vector<8x128xf32> to vector<1x8x128xf32>
    tpu.vector_store %arg2[%c11, %c0_59, %c0_60], %133 {strides = array<i32>} : memref<16x8x128xf32, #tpu.memory_space<vmem>>, vector<1x8x128xf32>,
    %cst_61 = arith.constant 0.0963537171 : f32
    %134 = vector.broadcast %cst_61 : f32 to vector<8x128xf32>
    %135 = arith.mulf %134, %115 : vector<8x128xf32>
    %136 = arith.mulf %135, %43 : vector<8x128xf32>
    %c14 = arith.constant 14 : index
    %c0_62 = arith.constant 0 : index
    %c0_63 = arith.constant 0 : index
    %137 = vector.load %arg2[%c14, %c0_62, %c0_63] : memref<16x8x128xf32, #tpu.memory_space<vmem>>, vector<1x8x128xf32>
    %138 = vector.shape_cast %137 : vector<1x8x128xf32> to vector<8x128xf32>
    %139 = vector.shape_cast %136 : vector<8x128xf32> to vector<1x8x128xf32>
    tpu.vector_store %arg2[%c14, %c0_62, %c0_63], %139 {strides = array<i32>} : memref<16x8x128xf32, #tpu.memory_space<vmem>>, vector<1x8x128xf32>,
    %140 = arith.mulf %135, %46 : vector<8x128xf32>
    %c10 = arith.constant 10 : index
    %c0_64 = arith.constant 0 : index
    %c0_65 = arith.constant 0 : index
    %141 = vector.load %arg2[%c10, %c0_64, %c0_65] : memref<16x8x128xf32, #tpu.memory_space<vmem>>, vector<1x8x128xf32>
    %142 = vector.shape_cast %141 : vector<1x8x128xf32> to vector<8x128xf32>
    %143 = vector.shape_cast %140 : vector<8x128xf32> to vector<1x8x128xf32>
    tpu.vector_store %arg2[%c10, %c0_64, %c0_65], %143 {strides = array<i32>} : memref<16x8x128xf32, #tpu.memory_space<vmem>>, vector<1x8x128xf32>,
    %cst_66 = arith.constant 0.0393362381 : f32
    %144 = vector.broadcast %cst_66 : f32 to vector<8x128xf32>
    %145 = arith.mulf %144, %118 : vector<8x128xf32>
    %146 = arith.mulf %145, %90 : vector<8x128xf32>
    %c15 = arith.constant 15 : index
    %c0_67 = arith.constant 0 : index
    %c0_68 = arith.constant 0 : index
    %147 = vector.load %arg2[%c15, %c0_67, %c0_68] : memref<16x8x128xf32, #tpu.memory_space<vmem>>, vector<1x8x128xf32>
    %148 = vector.shape_cast %147 : vector<1x8x128xf32> to vector<8x128xf32>
    %149 = vector.shape_cast %146 : vector<8x128xf32> to vector<1x8x128xf32>
    tpu.vector_store %arg2[%c15, %c0_67, %c0_68], %149 {strides = array<i32>} : memref<16x8x128xf32, #tpu.memory_space<vmem>>, vector<1x8x128xf32>,
    %150 = arith.mulf %145, %94 : vector<8x128xf32>
    %c9 = arith.constant 9 : index
    %c0_69 = arith.constant 0 : index
    %c0_70 = arith.constant 0 : index
    %151 = vector.load %arg2[%c9, %c0_69, %c0_70] : memref<16x8x128xf32, #tpu.memory_space<vmem>>, vector<1x8x128xf32>
    %152 = vector.shape_cast %151 : vector<1x8x128xf32> to vector<8x128xf32>
    %153 = vector.shape_cast %150 : vector<8x128xf32> to vector<1x8x128xf32>
    tpu.vector_store %arg2[%c9, %c0_69, %c0_70], %153 {strides = array<i32>} : memref<16x8x128xf32, #tpu.memory_space<vmem>>, vector<1x8x128xf32>,
    return
  }
  func.func @transform_0(%arg0: i32) -> (i32, i32, i32) {
    %c0_i32 = arith.constant 0 : i32
    %c0_i32_0 = arith.constant 0 : i32
    %c0_i32_1 = arith.constant 0 : i32
    return %c0_i32, %arg0, %c0_i32_0 : i32, i32, i32
  }
  func.func @transform_1(%arg0: i32) -> (i32, i32, i32) {
    %c0_i32 = arith.constant 0 : i32
    %c0_i32_0 = arith.constant 0 : i32
    %c0_i32_1 = arith.constant 0 : i32
    return %c0_i32, %arg0, %c0_i32_0 : i32, i32, i32
  }
}

</mosaic_0001>

<bundles_post_ra>
// kernel: tpu_custom_call.1
= control target key start
LH: loop header
LB: loop body
LE: loop exit
PB: predicated region body
PF: predicated region fallthrough
CT: control target
= control target key end

     0   :  { %6 = vsyncpa [#allocation3], 0  ;;  %s1219_s0 = inlined_call_operand.hbm [shape: f32[3,16,128], index: 0, kind: input, shape index: {}]   ;;  %s1220_s1 = inlined_call_operand.hbm [shape: f32[16,16,128], index: 1, kind: output, shape index: {}]  }
   0x1   :  { %8 = vsyncpa [#allocation3 + $0x1], 0 }
   0x2   :  { %9 = vsyncpa [#allocation4], 0 }
   0x3   :  { %11 = vsyncpa [#allocation4 + $0x1], 0  ;;  %s965_s6 = smov 0   ;;  %s967_s7 = smov 0  }
   0x4   :  { %s969_s8 = smov 0   ;;  %s971_s9 = smov 0  }
   0x5 LB: > { %s986_s10 = sadd.s32 4294967295, %s938_s9   ;;  %s725_s11 = sadd.s32 4294967294, %s938_s9   ;;  %s938_s9 = sphi %s971_s9, %s1235_s9   ;;  %s934_s8 = sphi %s969_s8, %s1234_s8   ;;  %s930_s7 = sphi %s967_s7, %s1233_s7   ;;  %s926_s6 = sphi %s965_s6, %s1232_s6  }
   0x6   : > { %s990_s12 = sadd.s32 1, %s938_s9   ;;  %s24_s13 = sadd.s32 1, %s934_s8 }
   0x7   : > { %s21_s14 = ssub.s32 %s938_s9, %s990_s12  ;;  %p31_p0 = scmp.ne.s32.totalorder %s934_s8, %s930_s7 }
   0x8   : > { %p22_p1 = scmp.eq.s32.totalorder %s21_s14, 0  ;;  %p32_p2 = scmp.eq.s32.totalorder %s938_s9, 0 }
   0x9   : > { %p37_p3 = scmp.ne.s32.totalorder %s930_s7, %s926_s6  ;;  %p38_p4 = scmp.eq.s32.totalorder %s986_s10, 0 }
   0xa   : > { %s1002_s15 = scalar_select %p22_p1, %s934_s8, %s24_s13  }
   0xb   : > { %p33_p5 = por %p32_p2, %p31_p0  ;;  %p1004_p6 = por %p38_p4, %p37_p3 }
   0xc   : > { %p61_p7 = scmp.eq.s32.totalorder %s986_s10, 1  ;;  %p67_p8 = scmp.eq.s32.totalorder %s725_s11, 1 }
   0xd   : > { %s1223_s16 = scalar_select %p1004_p6, 1, 0 }
   0xe   : > { %p791_p10 = scmp.lt.s32.totalorder %s938_s9, 2  ;;  %p1011_p11 = por %p61_p7, %p31_p0 }
   0xf   : > { %p1015_p12 = por %p67_p8, %p37_p3  ;;  %s87_s19 = sand.u32 1, %s934_s8  }
  0x10   : > { %s1224_s17 = scalar_select %p1011_p11, 1, 0 }
  0x11   : > { %s1225_s18 = scalar_select %p1015_p12, 1, 0 }
  0x12   : > { %s728_s20 = sshll.u32 %s938_s9, 7  ;;  %s769_s21 = smul.u32 24, %s87_s19 }
  0x13   : > { %s1024_s24 = scalar_lea.hbm %s1219_s0, %s728_s20  ;;  %p1026_p13 = pnand %p791_p10, %p33_p5 }
  0x14   : > { %s91_s26 = scalar_lea.vmem [#allocation2], %s769_s21  ;;  %s1033_s28 = scalar_lea.sflag [#allocation3], %s87_s19 }
  0x15   : > { %s97_s27 = sshll.u32 %s91_s26, 4  ;;  %s846_s29 = scalar_lea.hbm %s1024_s24, 384  ;;  %s1030_s27 = int_to_ptr.vmem [resolvable:$true] %s97_s27 }
  0x16   : > { %p847_p1 = scmp.ne.s32.totalorder %s1024_s24, %s846_s29  ;;  %p848_p2 = pneg %p1026_p13 }
  0x17   : > { %s851_s3 = scalar_lea.hbm %s1219_s0, 768  ;;  %p852_p5 = scmp.lt.s32.totalorder %s1024_s24, %s1219_s0 }
  0x18   : > { %p849_p3 = pnand %p848_p2, %p847_p1  ;;  %p853_p7 = scmp.lt.s32.totalorder %s851_s3, %s846_s29 }
  0x1a   : > { %p850_p4 = pneg %p849_p3  ;;  %p854_p8 = por %p853_p7, %p852_p5 }
  0x1c   : > { %p855_p10 = pnand %p854_p8, %p850_p4 }
  0x1e   : > { %858 = shalt.err (!%p855_p10)
}
  0x1f   : > { %s859_s11 = scalar_lea.vmem %s1030_s27, 384  ;;  %s940_s13 = smov [#allocation2]  }
  0x20   : > { %p860_p9 = scmp.ne.s32.totalorder %s1030_s27, %s859_s11  ;;  %s864_s14 = sshll.u32 %s940_s13, 4  ;;  %s865_s14 = int_to_ptr.vmem [resolvable:$false] %s864_s14 }
  0x21   : > { %s866_s19 = scalar_lea.vmem %s865_s14, 768  ;;  %p867_p3 = scmp.lt.s32.totalorder %s1030_s27, %s865_s14 }
  0x22   : > { %p862_p0 = pnand %p860_p9, %p848_p2  ;;  %p868_p12 = scmp.lt.s32.totalorder %s866_s19, %s859_s11 }
  0x24   : > { %p863_p1 = pneg %p862_p0  ;;  %p869_p11 = por %p868_p12, %p867_p3 }
  0x26   : > { %p870_p6 = pnand %p869_p11, %p863_p1 }
  0x28   : > { %873 = shalt.err (!%p870_p6)
}
  0x29   : > { %s941_s20 = smov 256   ;;  %s942_s21 = smov 128  }
  0x2a   : > { %s943_s22 = smov 8   ;;  %p105_p9 = scmp.lt.s32.totalorder %s938_s9, 3 }
  0x2b   : > { %786 = dma.hbm_to_vmem [thread:$0]  (!%p1026_p13), %s1024_s24, 384, %s1030_s27, %s1033_s28, %s941_s20, %s942_s21, %s943_s22  }
  0x2c   : > { %p1227_p0 = scmp.ge.s32.totalorder %s938_s9, 1 }
  0x2e   : > { %p106_p2 = pnand %p1227_p0, %p105_p9 }
  0x2f   : > { %s1058_s23 = sand.u32 (!%p106_p2), 1, %s930_s7   ;;  %p1228_p6 = scmp.ne.s32.totalorder (!%p106_p2), %s1223_s16, 0 }
  0x30   : > { %109 = sbr.rel (%p106_p2) target bundleno = 177 (0xb1), region = 24  ;;  %s112_s29 = scalar_lea.sflag (!%p106_p2), [#allocation3], %s1058_s23 }
  0x31   : > { %s770_s26 = smul.u32 (!%p106_p2), 24, %s1058_s23 }
  0x33   : > { %s1062_s30 = scalar_lea.vmem (!%p106_p2), [#allocation2], %s770_s26 }
  0x35   : > { %917 = dma.done.wait (%p1228_p6), %s112_s29, 384  }
  0x36   : > { %919 = vsyncadd (%p1228_p6), %s112_s29, 4294966912  ;;  %s730_s24 = sshll.u32 %s1058_s23, 7  ;;  %v944_v0 = vmov 0.2820948   ;;  %v1073_v1 = vld [vmem:[%s1062_s30 + $0x8] sm:$0xff]  ;;  %v1076_v2 = vld [vmem:[%s1062_s30 + $0x10] sm:$0xff] }
  0x37   : > { %s1069_s25 = scalar_lea.vmem [#allocation5], %s730_s24  ;;  %v139_v3 = vand.u32 2147483647, %v1073_v1  ;;  %v142_v4 = vand.u32 2139095040, %v1073_v1  ;;  %v346_v5 = vand.u32 2147483647, %v1076_v2 }
  0x38   : > { %556 = vst [vmem:[%s1069_s25] sm:$0xff] %v944_v0  ;;  %v349_v6 = vand.u32 2139095040, %v1076_v2  ;;  %v945_v25 = vmov 683565275   ;;  %v946_v27 = vmov 2475754826   ;;  %vm141_vm14 = vcmp.lt.s32.totalorder %v1073_v1, 0 }
  0x39   : > { %v143_v7 = vshrl.u32 %v142_v4, 23  ;;  %v146_v8 = vand.u32 8388607, %v139_v3  ;;  %v353_v10 = vand.u32 8388607, %v346_v5  ;;  %s766_s16 = sshll.u32 %s986_s10, 7 }
  0x3a   : > { %v350_v9 = vshrl.u32 %v349_v6, 23  ;;  %v947_v29 = vmov 2131351028   ;;  %v948_v31 = vmov 2102212464   ;;  %s652_s27 = sshll.u32 %s1069_s25, 4  ;;  %s1172_s10 = scalar_lea.hbm %s1220_s1, %s766_s16  ;;  %s1174_s27 = int_to_ptr.vmem [resolvable:$true] %s652_s27 }
  0x3b   : > { %v733_v11 = vadd.s32 4294967169, %v143_v7  ;;  %v147_v14 = vor.u32 8388608, %v146_v8  ;;  %v354_v15 = vor.u32 8388608, %v353_v10  ;;  %v949_v33 = vmov 920167782   ;;  %s640_s3 = scalar_lea.sflag [#allocation4], %s1058_s23 }
  0x3c   : > { %v741_v12 = vadd.s32 4294967169, %v350_v9  ;;  %v950_v41 = vmov 1326507024   ;;  %vm140_vm15 = vcmp.le.f32.partialorder %v139_v3, 0.7853982  ;;  %s874_s4 = scalar_lea.vmem %s1174_s27, 2048 }
  0x3d   : > { %v149_v13 = vadd.s32 1, %v733_v11  ;;  %v1086_v21 = vshll.u32 %v147_v14, 8  ;;  %v1088_v23 = vshll.u32 %v354_v15, 8  ;;  %p875_p11 = scmp.ne.s32.totalorder %s1174_s27, %s874_s4  ;;  %p1229_p12 = scmp.ne.s32.totalorder %s1224_s17, 0 }
  0x3e   : > { %v356_v16 = vadd.s32 1, %v741_v12  ;;  %s951_s5 = smov [#allocation5]  }
  0x3f   : > { %vm150_vm0 = vcmp.gt.s32.totalorder %v149_v13, 0  ;;  %p876_p13 = pnand %p875_p11, %p1229_p12  ;;  %s878_s11 = sshll.u32 %s951_s5, 4  ;;  %s879_s11 = int_to_ptr.vmem [resolvable:$false] %s878_s11 }
  0x40   : > { %v151_v17 = vsel %vm150_vm0, %v149_v13, 0  ;;  %vm357_vm1 = vcmp.gt.s32.totalorder %v356_v16, 0  ;;  %vm348_vm0 = vcmp.lt.s32.totalorder %v1076_v2, 0  ;;  %s880_s13 = scalar_lea.vmem %s879_s11, 4096  ;;  %p881_p5 = scmp.lt.s32.totalorder %s1174_s27, %s879_s11 }
  0x41   : > { %v152_v18 = vshrl.u32 %v151_v17, 5  ;;  %v153_v19 = vand.u32 31, %v151_v17  ;;  %v358_v20 = vsel %vm357_vm1, %v356_v16, 0  ;;  %vm347_vm1 = vcmp.le.f32.partialorder %v346_v5, 0.7853982  ;;  %v134_v5 = vld [vmem:[%s1062_s30] sm:$0xff]  ;;  %p877_p4 = pneg %p876_p13  ;;  %p882_p7 = scmp.lt.s32.totalorder %s880_s13, %s874_s4 }
  0x42   : > { %v360_v22 = vand.u32 31, %v358_v20  ;;  %v1090_v35 = vshrl.u32 %v358_v20, 5 }
  0x43   : > { %v154_v24 = vsub.s32 32, %v153_v19  ;;  %v156_v26 = vshll.u32 %v945_v25, %v153_v19  ;;  %v159_v28 = vshll.u32 %v946_v27, %v153_v19  ;;  %v162_v30 = vshll.u32 %v947_v29, %v153_v19  ;;  %p883_p8 = por %p882_p7, %p881_p5 }
  0x44   : > { %v165_v32 = vshll.u32 %v948_v31, %v153_v19  ;;  %v168_v34 = vshll.u32 %v949_v33, %v153_v19  ;;  %vm171_vm2 = vcmp.lt.s32.totalorder %v152_v18, 1  ;;  %vm172_vm3 = vcmp.lt.s32.totalorder %v152_v18, 2 }
  0x45   : > { %v155_v36 = vshrl.u32 %v945_v25, %v154_v24  ;;  %v157_v37 = vshrl.u32 %v946_v27, %v154_v24  ;;  %v160_v38 = vshrl.u32 %v947_v29, %v154_v24  ;;  %v163_v39 = vshrl.u32 %v948_v31, %v154_v24  ;;  %p884_p10 = pnand %p883_p8, %p877_p4 }
  0x46   : > { %v166_v40 = vshrl.u32 %v949_v33, %v154_v24  ;;  %v169_v42 = vshrl.u32 %v950_v41, %v154_v24  ;;  %vm174_vm4 = vcmp.lt.s32.totalorder %v152_v18, 4  ;;  %v361_v46 = vsub.s32 32, %v360_v22 }
  0x47   : > { %v158_v43 = vor.u32 %v157_v37, %v156_v26  ;;  %v161_v44 = vor.u32 %v160_v38, %v159_v28  ;;  %v164_v45 = vor.u32 %v163_v39, %v162_v30  ;;  %vm173_vm5 = vcmp.lt.s32.totalorder %v152_v18, 3 }
  0x48   : > { %v167_v47 = vor.u32 %v166_v40, %v165_v32  ;;  %v170_v48 = vor.u32 %v169_v42, %v168_v34  ;;  %v363_v49 = vshll.u32 %v945_v25, %v360_v22  ;;  %v366_v57 = vshll.u32 %v946_v27, %v360_v22 }
  0x49   : > { %v175_v50 = vsel %vm171_vm2, %v155_v36, %v158_v43  ;;  %v176_v51 = vsel %vm174_vm4, %v164_v45, 2102212464  ;;  %v179_v52 = vsel %vm171_vm2, %v158_v43, %v161_v44  ;;  %v183_v53 = vsel %vm171_vm2, %v161_v44, %v164_v45 }
  0x4a   : > { %v177_v54 = vsel %vm173_vm5, %v161_v44, %v176_v51  ;;  %v180_v55 = vsel %vm174_vm4, %v167_v47, 920167782  ;;  %v184_v56 = vsel %vm174_vm4, %v170_v48, 1326507024  ;;  %v362_v60 = vshrl.u32 %v945_v25, %v361_v46 }
  0x4b   : > { %v181_v58 = vsel %vm173_vm5, %v164_v45, %v180_v55  ;;  %v185_v59 = vsel %vm173_vm5, %v167_v47, %v184_v56  ;;  %v364_v61 = vshrl.u32 %v946_v27, %v361_v46  ;;  %v178_v62 = vsel %vm172_vm3, %v175_v50, %v177_v54 }
  0x4c   : > { %v182_v63 = vsel %vm172_vm3, %v179_v52, %v181_v58  ;;  %v186_v0 = vsel %vm172_vm3, %v183_v53, %v185_v59  ;;  %v367_v4 = vshrl.u32 %v947_v29, %v361_v46  ;;  %v369_v12 = vshll.u32 %v947_v29, %v360_v22 }
  0x4d   : > { %v1099_v6 = vmul.u32.u64.low %v1086_v21, %v186_v0  ;;  %v1100_v7 = vmul.u32.u64.high %v1086_v21, %v186_v0, %v1099_v6  ;;  %v1103_v8 = vmul.u32.u64.low %v1086_v21, %v182_v63  ;;  %v1104_v9 = vmul.u32.u64.high %v1086_v21, %v182_v63, %v1103_v8 }
  0x4e   : > { %v365_v10 = vor.u32 %v364_v61, %v363_v49  ;;  %v368_v11 = vor.u32 %v367_v4, %v366_v57  ;;  %v370_v13 = vshrl.u32 %v948_v31, %v361_v46  ;;  %v372_v14 = vshll.u32 %v948_v31, %v360_v22 }
  0x4f   : > { %v373_v15 = vshrl.u32 %v949_v33, %v361_v46  ;;  %v375_v16 = vshll.u32 %v949_v33, %v360_v22  ;;  %v376_v17 = vshrl.u32 %v950_v41, %v361_v46  ;;  %v194_v18 = vmul.u32 %v1086_v21, %v178_v62 }
  0x50   : > { %v371_v19 = vor.u32 %v370_v13, %v369_v12  ;;  %vm378_vm6 = vcmp.lt.s32.totalorder %v1090_v35, 1  ;;  %vm379_vm7 = vcmp.lt.s32.totalorder %v1090_v35, 2  ;;  %vm196_vm8 = vc.u32 %v1100_v7, %v1103_v8 }
  0x51   : > { %v197_v20 = vadd.s32 1, %v1104_v9  ;;  %v374_v24 = vor.u32 %v373_v15, %v372_v14  ;;  %vm380_vm9 = vcmp.lt.s32.totalorder %v1090_v35, 3  ;;  %v377_v25 = vor.u32 %v376_v17, %v375_v16 }
  0x52   : > { %vm381_vm10 = vcmp.lt.s32.totalorder %v1090_v35, 4  ;;  %v382_v26 = vsel %vm378_vm6, %v362_v60, %v365_v10  ;;  %v386_v22 = vsel %vm378_vm6, %v365_v10, %v368_v11  ;;  %v390_v29 = vsel %vm378_vm6, %v368_v11, %v371_v19 }
  0x53   : > { %v198_v27 = vsel %vm196_vm8, %v197_v20, %v1104_v9  ;;  %v383_v21 = vsel %vm381_vm10, %v371_v19, 2102212464  ;;  %v387_v28 = vsel %vm381_vm10, %v374_v24, 920167782  ;;  %v391_v33 = vsel %vm381_vm10, %v377_v25, 1326507024 }
  0x54   : > { %v199_v30 = vadd.s32 %v198_v27, %v194_v18  ;;  %v384_v31 = vsel %vm380_vm9, %v368_v11, %v383_v21  ;;  %v388_v32 = vsel %vm380_vm9, %v371_v19, %v387_v28  ;;  %v392_v37 = vsel %vm380_vm9, %v374_v24, %v391_v33 }
  0x55   : > { %v385_v34 = vsel %vm379_vm7, %v382_v26, %v384_v31  ;;  %v389_v36 = vsel %vm379_vm7, %v386_v22, %v388_v32  ;;  %v393_v39 = vsel %vm379_vm7, %v390_v29, %v392_v37  ;;  %v195_v58 = vadd.s32 %v1103_v8, %v1100_v7 }
  0x56   : > { %v200_v38 = vadd.s32 536870912, %v199_v30  ;;  %v1121_v40 = vmul.u32.u64.low %v1088_v23, %v389_v36  ;;  %v1122_v41 = vmul.u32.u64.high %v1088_v23, %v389_v36, %v1121_v40  ;;  %v401_v45 = vmul.u32 %v1088_v23, %v385_v34 }
  0x57   : > { %v1125_v42 = vmul.u32.u64.low %v1088_v23, %v393_v39  ;;  %v1126_v43 = vmul.u32.u64.high %v1088_v23, %v393_v39, %v1125_v42  ;;  %vm231_vm6 = vweird.f32 %v1073_v1  ;;  %vm438_vm9 = vweird.f32 %v1076_v2 }
  0x58   : > { %v201_v44 = vshrl.u32 %v200_v38, 30  ;;  %v404_v47 = vadd.s32 1, %v1122_v41 }
  0x59   : > { %vm403_vm11 = vc.u32 %v1126_v43, %v1121_v40  ;;  %v402_v14 = vadd.s32 %v1121_v40, %v1126_v43 }
  0x5a   : > { %v202_v46 = vshll.u32 %v201_v44, 30  ;;  %v405_v35 = vsel %vm403_vm11, %v404_v47, %v1122_v41  ;;  %v225_v25 = vsub.s32 4, %v201_v44 }
  0x5b   : > { %v406_v49 = vadd.s32 %v405_v35, %v401_v45 }
  0x5c   : > { %v203_v48 = vsub.s32 %v199_v30, %v202_v46  ;;  %v226_v30 = vsel %vm141_vm14, %v225_v25, %v201_v44 }
  0x5d   : > { %v407_v51 = vadd.s32 536870912, %v406_v49  ;;  %v228_v33 = vsel %vm140_vm15, 0, %v226_v30 }
  0x5e   : > { %v205_v50 = vsub.s32 0, %v203_v48  ;;  %v335_v34 = vadd.s32 3, %v228_v33  ;;  %v232_v39 = vand.u32 3, %v228_v33 }
  0x5f   : > { %v408_v53 = vshrl.u32 %v407_v51, 30 }
  0x60   : > { %v734_v52 = vmin.u32 %v205_v50, %v203_v48  ;;  %v336_v40 = vand.u32 3, %v335_v34  ;;  %vm237_vm2 = vcmp.eq.s32.totalorder %v232_v39, 2  ;;  %vm234_vm4 = vcmp.eq.s32.totalorder %v232_v39, 0 }
  0x61   : > { %v409_v55 = vshll.u32 %v408_v53, 30  ;;  %v432_v36 = vsub.s32 4, %v408_v53  ;;  %vm233_vm7 = vcmp.lt.s32.totalorder %v232_v39, 2  ;;  %v555_v50 = vmul.f32 %v134_v5, %v134_v5 }
  0x62   : > { %v207_v54 = vclz %v734_v52  ;;  %vm341_vm3 = vcmp.eq.s32.totalorder %v336_v40, 2  ;;  %vm338_vm5 = vcmp.eq.s32.totalorder %v336_v40, 0  ;;  %vm337_vm8 = vcmp.lt.s32.totalorder %v336_v40, 2 }
  0x63   : > { %v410_v57 = vsub.s32 %v406_v49, %v409_v55  ;;  %v433_v41 = vsel %vm348_vm0, %v432_v36, %v408_v53 }
  0x64   : > { %v735_v56 = vadd.s32 4294967294, %v207_v54  ;;  %v435_v42 = vsel %vm347_vm1, 0, %v433_v41 }
  0x65   : > { %v412_v59 = vsub.s32 0, %v410_v57  ;;  %v542_v44 = vadd.s32 3, %v435_v42  ;;  %v439_v49 = vand.u32 3, %v435_v42 }
  0x66   : > { %vm736_vm12 = vcmp.lt.s32.totalorder %v735_v56, 0 }
  0x67   : > { %v210_v23 = vsel %vm736_vm12, 0, %v735_v56  ;;  %v742_v63 = vmin.u32 %v412_v59, %v410_v57  ;;  %v543_v53 = vand.u32 3, %v542_v44  ;;  %vm440_vm10 = vcmp.lt.s32.totalorder %v439_v49, 2 }
  0x68   : > { %v211_v60 = vsub.s32 32, %v210_v23  ;;  %v212_v61 = vshll.u32 %v203_v48, %v210_v23  ;;  %v215_v62 = vsub.s32 4294967266, %v210_v23  ;;  %vm441_vm11 = vcmp.eq.s32.totalorder %v439_v49, 0 }
  0x69   : > { %v414_v6 = vclz %v742_v63  ;;  %vm444_vm12 = vcmp.eq.s32.totalorder %v439_v49, 2 }
  0x6a   : > { %v213_v0 = vshrl.u32 %v195_v58, %v211_v60  ;;  %v216_v4 = vadd.s32 127, %v215_v62  ;;  %v602_v58 = vmul.f32 2.0, %v555_v50 }
  0x6b   : > { %v743_v11 = vadd.s32 4294967294, %v414_v6 }
  0x6c   : > { %v214_v9 = vor.u32 %v213_v0, %v212_v61  ;;  %v217_v10 = vshll.u32 %v216_v4, 23 }
  0x6d   : > { %vm744_vm13 = vcmp.lt.s32.totalorder %v743_v11, 0 }
  0x6e   : > { %v218_v12 = vor.u32 4788187, %v217_v10  ;;  %v221_v13 = vcvt.s32.f32 %v214_v9  ;;  %v417_v7 = vsel %vm744_vm13, 0, %v743_v11  ;;  %vm544_vm13 = vcmp.lt.s32.totalorder %v543_v53, 2 }
  0x6f   : > { %v418_v8 = vsub.s32 32, %v417_v7  ;;  %v419_v16 = vshll.u32 %v410_v57, %v417_v7  ;;  %v422_v17 = vsub.s32 4294967266, %v417_v7 }
  0x70   : > { %v219_v15 = vand.u32 2147483647, %v218_v12 }
  0x71   : > { %v420_v19 = vshrl.u32 %v402_v14, %v418_v8  ;;  %v423_v20 = vadd.s32 127, %v422_v17 }
  0x72   : > { %v222_v18 = vmul.f32 %v221_v13, %v219_v15 }
  0x73   : > { %v421_v26 = vor.u32 %v420_v19, %v419_v16  ;;  %v424_v22 = vshll.u32 %v423_v20, 23 }
  0x74   : > { %v223_v24 = vxor.u32 2147483648, %v222_v18 }
  0x75   : > { %v425_v28 = vor.u32 4788187, %v424_v22  ;;  %v428_v29 = vcvt.s32.f32 %v421_v26 }
  0x76   : > { %v224_v27 = vsel %vm141_vm14, %v223_v24, %v222_v18  ;;  %vm545_vm14 = vcmp.eq.s32.totalorder %v543_v53, 0 }
  0x77   : > { %v227_v21 = vsel %vm140_vm15, %v1073_v1, %v224_v27  ;;  %v426_v31 = vand.u32 2147483647, %v425_v28  ;;  %v608_v1 = vmul.f32 3.0, %v555_v50  ;;  %vm548_vm15 = vcmp.eq.s32.totalorder %v543_v53, 2 }
  0x78   : > { %838 = vcosq.f32 %v227_v21 }
  0x79   : > { %840 = vsinq.f32 %v227_v21  ;;  %v429_v32 = vmul.f32 %v428_v29, %v426_v31 }
  0x7b   : > { %v430_v3 = vxor.u32 2147483648, %v429_v32 }
  0x7d   : > { %v431_v37 = vsel %vm348_vm0, %v430_v3, %v429_v32 }
  0x7e   : > { %v434_v38 = vsel %vm347_vm1, %v1076_v2, %v431_v37 }
  0x7f   : > { %842 = vcosq.f32 %v434_v38 }
  0x80   : > { %844 = vsinq.f32 %v434_v38 }
  0x85   : > { %v839_v43 = vpop.eup %838 }
  0x86   : > { %v841_v45 = vpop.eup %840  ;;  %v238_v46 = vxor.u32 2147483648, %v839_v43 }
  0x87   : > { %v235_v47 = vxor.u32 2147483648, %v841_v45 }
  0x88   : > { %v239_v48 = vsel %vm237_vm2, %v238_v46, %v841_v45  ;;  %v343_v35 = vsel %vm341_vm3, %v238_v46, %v841_v45 }
  0x89   : > { %v236_v51 = vsel %vm234_vm4, %v839_v43, %v235_v47  ;;  %v340_v52 = vsel %vm338_vm5, %v839_v43, %v235_v47 }
  0x8a   : > { %v240_v54 = vsel %vm233_vm7, %v236_v51, %v239_v48  ;;  %v344_v55 = vsel %vm337_vm8, %v340_v52, %v343_v35 }
  0x8b   : > { %v241_v56 = vsel %vm231_vm6, nan, %v240_v54  ;;  %v345_v57 = vsel %vm231_vm6, nan, %v344_v55 }
  0x8c   : > { %v553_v23 = vmul.f32 %v241_v56, %v134_v5  ;;  %v554_v59 = vmul.f32 %v345_v57, %v134_v5  ;;  %v843_v60 = vpop.eup %842 }
  0x8d   : > { %v845_v0 = vpop.eup %844  ;;  %v445_v4 = vxor.u32 2147483648, %v843_v60 }
  0x8e   : > { %v557_v61 = vmul.f32 0.48860252, %v553_v23  ;;  %v571_v62 = vmul.f32 3.0, %v553_v23  ;;  %v577_v63 = vmul.f32 3.0, %v554_v59  ;;  %v560_v6 = vmul.f32 0.48860252, %v554_v59 }
  0x8f   : > { %v600_v9 = vmul.f32 5.0, %v553_v23  ;;  %v603_v10 = vmul.f32 %v602_v58, %v553_v23  ;;  %v442_v11 = vxor.u32 2147483648, %v845_v0  ;;  %v446_v15 = vsel %vm444_vm12, %v445_v4, %v845_v0 }
  0x90   : > { %749 = vst [vmem:[%s1069_s25 + $0x10] sm:$0xff] %v557_v61  ;;  %v572_v12 = vmul.f32 %v571_v62, %v553_v23  ;;  %v576_v13 = vmul.f32 %v571_v62, %v554_v59  ;;  %v578_v14 = vmul.f32 %v577_v63, %v554_v59  ;;  %v550_v7 = vsel %vm548_vm15, %v445_v4, %v845_v0 }
  0x91   : > { %v609_v8 = vmul.f32 %v608_v1, %v554_v59  ;;  %v613_v16 = vmul.f32 5.0, %v554_v59  ;;  %v443_v17 = vsel %vm441_vm11, %v843_v60, %v442_v11  ;;  %v547_v18 = vsel %vm545_vm14, %v843_v60, %v442_v11 }
  0x92   : > { %v573_v19 = vsub.f32 %v572_v12, %v555_v50  ;;  %v582_v20 = vmul.f32 0.3641828, %v576_v13  ;;  %v447_v24 = vsel %vm440_vm10, %v443_v17, %v446_v15  ;;  %v551_v25 = vsel %vm544_vm13, %v547_v18, %v550_v7 }
  0x93   : > { %v589_v26 = vmul.f32 0.1820914, %v578_v14  ;;  %v607_v22 = vmul.f32 %v600_v9, %v576_v13  ;;  %v448_v27 = vsel %vm438_vm9, nan, %v447_v24  ;;  %v552_v21 = vsel %vm438_vm9, nan, %v551_v25 }
  0x94   : > { %v575_v28 = vmul.f32 0.5, %v573_v19  ;;  %v612_v29 = vmul.f32 %v600_v9, %v578_v14  ;;  %v561_v30 = vmul.f32 %v560_v6, %v448_v27  ;;  %v564_v31 = vmul.f32 %v560_v6, %v552_v21 }
  0x95   : > { %v583_v32 = vmul.f32 %v582_v20, %v448_v27  ;;  %v586_v33 = vmul.f32 %v582_v20, %v552_v21  ;;  %v567_v3 = vmul.f32 2.0, %v448_v27  ;;  %v610_v37 = vsub.f32 %v607_v22, %v609_v8 }
  0x96   : > { %v579_v34 = vmul.f32 0.63078314, %v575_v28  ;;  %v601_v36 = vmul.f32 %v600_v9, %v575_v28  ;;  %750 = vst [vmem:[%s1069_s25 + $0x18] sm:$0xff] %v561_v30  ;;  %751 = vst [vmem:[%s1069_s25 + $0x8] sm:$0xff] %v564_v31  ;;  %v625_v38 = vmul.f32 0.09635372, %v612_v29  ;;  %v614_v39 = vmul.f32 %v613_v16, %v578_v14 }
  0x97   : > { %754 = vst [vmem:[%s1069_s25 + $0x38] sm:$0xff] %v583_v32  ;;  %755 = vst [vmem:[%s1069_s25 + $0x28] sm:$0xff] %v586_v33  ;;  %v568_v2 = vmul.f32 %v567_v3, %v448_v27  ;;  %v570_v40 = vmul.f32 %v567_v3, %v552_v21  ;;  %v611_v42 = vmul.f32 0.5, %v610_v37 }
  0x98   : > { %753 = vst [vmem:[%s1069_s25 + $0x30] sm:$0xff] %v579_v34  ;;  %v604_v41 = vsub.f32 %v601_v36, %v603_v10  ;;  %v632_v47 = vmul.f32 0.039336238, %v614_v39 }
  0x99   : > { %v752_v43 = vadd.f32 -1.0, %v568_v2  ;;  %v593_v44 = vmul.f32 %v589_v26, %v570_v40  ;;  %v618_v46 = vmul.f32 0.3046972, %v611_v42  ;;  %v629_v5 = vmul.f32 %v625_v38, %v570_v40 }
  0x9a   : > { %v606_v45 = vmul.f32 0.33333334, %v604_v41  ;;  %v598_v48 = vmul.f32 %v570_v40, %v567_v3 }
  0x9b   : > { %v590_v35 = vmul.f32 %v752_v43, %v589_v26  ;;  %757 = vst [vmem:[%s1069_s25 + $0x20] sm:$0xff] %v593_v44  ;;  %v619_v50 = vmul.f32 %v618_v46, %v448_v27  ;;  %v622_v51 = vmul.f32 %v618_v46, %v552_v21  ;;  %v626_v52 = vmul.f32 %v752_v43, %v625_v38 }
  0x9c   : > { %v615_v49 = vmul.f32 0.7463527, %v606_v45  ;;  %762 = vst [vmem:[%s1069_s25 + $0x50] sm:$0xff] %v629_v5  ;;  %v596_v53 = vmul.f32 %v752_v43, %v567_v3  ;;  %v599_v54 = vsub.f32 %v598_v48, %v552_v21 }
  0x9d   : > { %756 = vst [vmem:[%s1069_s25 + $0x40] sm:$0xff] %v590_v35  ;;  %759 = vst [vmem:[%s1069_s25 + $0x68] sm:$0xff] %v619_v50 }
  0x9e   : > { %758 = vst [vmem:[%s1069_s25 + $0x60] sm:$0xff] %v615_v49  ;;  %760 = vst [vmem:[%s1069_s25 + $0x58] sm:$0xff] %v622_v51  ;;  %v597_v55 = vsub.f32 %v596_v53, %v448_v27  ;;  %v636_v56 = vmul.f32 %v632_v47, %v599_v54 }
  0x9f   : > { %761 = vst [vmem:[%s1069_s25 + $0x70] sm:$0xff] %v626_v52 }
  0xa0   : > { %v633_v57 = vmul.f32 %v632_v47, %v597_v55  ;;  %764 = vst [vmem:[%s1069_s25 + $0x48] sm:$0xff] %v636_v56 }
  0xa2   : > { %763 = vst [vmem:[%s1069_s25 + $0x78] sm:$0xff] %v633_v57 }
  0xa3   : > { %887 = shalt.err (!%p884_p10)
}
  0xa4   : > { %s888_s14 = scalar_lea.hbm %s1172_s10, 2048  ;;  %s892_s21 = scalar_lea.hbm %s1220_s1, 4096 }
  0xa5   : > { %p889_p1 = scmp.ne.s32.totalorder %s1172_s10, %s888_s14  ;;  %p893_p0 = scmp.lt.s32.totalorder %s1172_s10, %s1220_s1 }
  0xa6   : > { %p894_p2 = scmp.lt.s32.totalorder %s892_s21, %s888_s14 }
  0xa7   : > { %p890_p3 = pnand %p889_p1, %p1229_p12 }
  0xa8   : > { %p895_p6 = por %p894_p2, %p893_p0 }
  0xa9   : > { %p891_p9 = pneg %p890_p3 }
  0xab   : > { %p896_p11 = pnand %p895_p6, %p891_p9 }
  0xad   : > { %899 = shalt.err (!%p896_p11)
}
  0xae   : > { %s952_s29 = smov 128   ;;  %s953_s30 = smov 256  }
  0xaf   : > { %s954_s24 = smov 8  }
  0xb0   : > { %781 = dma.vmem_to_hbm [thread:$0]  (%p1229_p12), %s1174_s27, 2048, %s1172_s10, %s640_s3, %s952_s29, %s953_s30, %s954_s24  }
  0xb1 PF: > { %s667_s25 = sand.u32 1, %s926_s6   ;;  %p1230_p13 = scmp.ne.s32.totalorder %s1225_s18, 0 }
  0xb2   : > { %p1231_p4 = scmp.ge.s32.totalorder %s938_s9, 2  ;;  %s668_s16 = scalar_lea.sflag [#allocation4], %s667_s25 }
  0xb4   : > { %p788_p5 = pnand %p1231_p4, %p1230_p13 }
  0xb6   : > { %p789_p7 = pneg %p788_p5 }
  0xb8   : > { %921 = dma.done.wait (%p789_p7), %s668_s16, 2048  }
  0xb9   : > { %923 = vsyncadd (%p789_p7), %s668_s16, 4294965248  ;;  %p14_p8 = scmp.ge.s32.totalorder %s990_s12, 4   ;;  %s1232_s6 = smov %s930_s7 }
  0xba   : > { %s1233_s7 = smov %s934_s8  ;;  %s1234_s8 = smov %s1002_s15 }
  0xbb   : > { %s1235_s9 = smov %s990_s12  ;;  %16 = sbr.rel (!%p14_p8) target bundleno = 5 (0x5), region = 86 }
  0xc0   :  { %673 = vsyncpa [#allocation3], 1 }
  0xc1   :  { %675 = vsyncpa [#allocation3 + $0x1], 1 }
  0xc2   :  { %676 = vsyncpa [#allocation4], 1 }
  0xc3   :  { %678 = vsyncpa [#allocation4 + $0x1], 1 }

</bundles_post_ra>
